<compile_context>
chip_gen: v7x
topology: tpu7x:2x2x1
jax: 0.10.0
libtpu: 0.0.40
codegen_flags: <defaults>
</compile_context>

<pallas_src>
import functools

import jax
import jax.numpy as jnp
from jax.experimental import pallas as pl
from jax.experimental.pallas import tpu as pltpu


def _round_up(x, m):
    return (x + m - 1) // m * m


# ----------------------------------------------------------------------------- kernel
def fused_actor_critic_kernel(x_ref, p_ref, out_ref, *, obs_p, H2p, nop, act_dim):
    """One fused forward step for a (TB, obs_p) batch tile.

    Packed-parameter row layout (ncols = max(H2p, nop), all blocks zero padded):
      rows [0,           obs_p)        : W1 = [w1a | w1c]          (obs_p, H2p)
      rows [obs_p,       obs_p+H2p)    : W2 = blockdiag(w2a, w2c)  (H2p, H2p)
      rows [obs_p+H2p,   obs_p+2*H2p)  : W3 = blockdiag(w3a, w3c)  (H2p, nop)
      row   r_b                        : b1 = [b1a | b1c]          (own 8-row slot)
      row   r_b + 8                    : b2 = [b2a | b2c]          (own 8-row slot)
      row   r_b + 16                   : b3 = [b3a | b3c | 0]      (own 8-row slot)
    All row offsets are multiples of 8; all column widths are multiples of 128.
    """
    r_w2 = obs_p
    r_w3 = obs_p + H2p
    r_b = obs_p + 2 * H2p
    bf16 = jnp.bfloat16

    # bf16 operands into the MXU, f32 accumulate, f32 elementwise.
    x = x_ref[...].astype(bf16)                              # (TB, obs_p)
    w1 = p_ref[0:r_w2, 0:H2p].astype(bf16)                   # (obs_p, H2p)
    w2 = p_ref[r_w2:r_w3, 0:H2p].astype(bf16)                # (H2p, H2p)
    w3 = p_ref[r_w3:r_b, 0:nop].astype(bf16)                 # (H2p, nop)
    b1 = p_ref[r_b:r_b + 1, 0:H2p]                           # (1, H2p)  f32
    b2 = p_ref[r_b + 8:r_b + 9, 0:H2p]                       # (1, H2p)  f32
    b3 = p_ref[r_b + 16:r_b + 17, 0:nop]                     # (1, nop)  f32

    # Fused actor+critic trunk: 3 MXU passes instead of 6.
    h = jnp.tanh(jnp.dot(x, w1, preferred_element_type=jnp.float32) + b1)
    h = jnp.tanh(jnp.dot(h.astype(bf16), w2, preferred_element_type=jnp.float32) + b2)
    y = jnp.dot(h.astype(bf16), w3, preferred_element_type=jnp.float32) + b3   # (TB, nop)

    # Lane-masked, numerically stable softmax over the first act_dim lanes.
    lane = jax.lax.broadcasted_iota(jnp.int32, y.shape, 1)
    is_logit = lane < act_dim
    is_value = lane == act_dim
    m = jnp.max(jnp.where(is_logit, y, -jnp.inf), axis=-1, keepdims=True)
    e = jnp.where(is_logit, jnp.exp(y - m), 0.0)
    s = jnp.sum(e, axis=-1, keepdims=True)
    r = pl.reciprocal(s, approx=True)
    r = r * (2.0 - s * r)                 # one Newton step -> ~full f32 accuracy
    probs = e * r

    # Lane-dense full-tile writeback: [probs | value | zeros] via lane select (no concat).
    out_ref[...] = jnp.where(is_logit, probs, jnp.where(is_value, y, 0.0))


# ----------------------------------------------------------------------------- packing
def pack_params(p, obs_dim, act_dim, hidden):
    """Pack all 12 actor/critic tensors into one tile-aligned f32 buffer (one DMA)."""
    H2 = 2 * hidden
    H2p = _round_up(H2, 128)
    no = act_dim + 1
    nop = _round_up(no, 128)
    obs_p = _round_up(obs_dim, 8)
    ncols = max(H2p, nop)

    w1 = jnp.zeros((obs_p, ncols), jnp.float32)
    w1 = w1.at[:obs_dim, :hidden].set(p["w1a"]).at[:obs_dim, hidden:H2].set(p["w1c"])

    w2 = jnp.zeros((H2p, ncols), jnp.float32)
    w2 = w2.at[:hidden, :hidden].set(p["w2a"]).at[hidden:H2, hidden:H2].set(p["w2c"])

    w3 = jnp.zeros((H2p, ncols), jnp.float32)
    w3 = w3.at[:hidden, :act_dim].set(p["w3a"]).at[hidden:H2, act_dim:no].set(p["w3c"])

    b1 = jnp.zeros((8, ncols), jnp.float32)
    b1 = b1.at[0:1, :hidden].set(p["b1a"]).at[0:1, hidden:H2].set(p["b1c"])
    b2 = jnp.zeros((8, ncols), jnp.float32)
    b2 = b2.at[0:1, :hidden].set(p["b2a"]).at[0:1, hidden:H2].set(p["b2c"])
    b3 = jnp.zeros((8, ncols), jnp.float32)
    b3 = b3.at[0:1, :act_dim].set(p["b3a"]).at[0:1, act_dim:no].set(p["b3c"])

    packed = jnp.concatenate([w1, w2, w3, b1, b2, b3], axis=0)
    return packed                                   # (obs_p + 2*H2p + 24, ncols)


# ----------------------------------------------------------------------------- wrapper
def actor_critic_forward(x, packed, *, obs_dim, act_dim, hidden, tb=4096):
    """x: (B, obs_dim) f32. Returns (action_probs (B, act_dim), value (B, 1))."""
    B = x.shape[0]
    obs_p = _round_up(obs_dim, 8)
    H2p = _round_up(2 * hidden, 128)
    nop = _round_up(act_dim + 1, 128)

    # Batch tiling: large tiles to amortize per-step overhead, but cap at ceil(B/2)
    # (rounded to 8) so the grid has >=2 steps and v7x's second TensorCore gets work.
    B8 = _round_up(B, 8)
    half = _round_up(pl.cdiv(B8, 2), 8)
    TB = max(8, min(_round_up(tb, 8), half))
    Bp = _round_up(B8, TB)
    grid = (Bp // TB,)

    xp = x
    if Bp != B or obs_p != obs_dim:
        xp = jnp.pad(x, ((0, Bp - B), (0, obs_p - obs_dim)))

    kernel = functools.partial(
        fused_actor_critic_kernel, obs_p=obs_p, H2p=H2p, nop=nop, act_dim=act_dim
    )

    # Advisory cost hint for XLA's scheduler around the custom call.
    cost = pl.CostEstimate(
        flops=2 * Bp * (obs_p * H2p + H2p * H2p + H2p * nop),
        transcendentals=Bp * (2 * H2p + nop),
        bytes_accessed=xp.size * 4 + packed.size * 4 + Bp * nop * 4,
    )

    # VMEM budget: double-buffered x/out tiles, resident params, headroom for temporaries.
    params_bytes = int(packed.size) * 4
    vmem_bytes = (
        2 * TB * obs_p * 4          # x tile (double buffered)
        + 2 * TB * nop * 4          # out tile (double buffered)
        + 2 * params_bytes          # resident packed params
        + 10 * TB * 128 * 4         # activation / cast temporaries headroom
        + (2 << 20)
    )
    vmem_bytes = min(vmem_bytes, 64 << 20)   # stay under v7x's 64 MiB physical VMEM

    out = pl.pallas_call(
        kernel,
        out_shape=jax.ShapeDtypeStruct((Bp, nop), jnp.float32),
        grid=grid,
        in_specs=[
            pl.BlockSpec((TB, obs_p), lambda i: (i, 0)),        # streamed batch tile
            pl.BlockSpec(packed.shape, lambda i: (0, 0)),       # resident packed params
        ],
        out_specs=pl.BlockSpec((TB, nop), lambda i: (i, 0)),    # lane-dense full-tile store
        compiler_params=pltpu.CompilerParams(
            dimension_semantics=("parallel",),                  # shards across TCs on v7x
            vmem_limit_bytes=int(vmem_bytes),
        ),
        cost_estimate=cost,
    )(xp, packed)

    probs = out[:B, :act_dim]
    value = out[:B, act_dim:act_dim + 1]
    return probs, value


# ----------------------------------------------------------------------------- init / references
def init_params(key, obs_dim, act_dim, hidden_size):
    """PyTorch nn.Linear-style init: U(-1/sqrt(fan_in), 1/sqrt(fan_in))."""
    def linear(key, fan_in, fan_out):
        kw, kb = jax.random.split(key)
        bound = 1.0 / jnp.sqrt(fan_in)
        w = jax.random.uniform(kw, (fan_in, fan_out), jnp.float32, -bound, bound)
        b = jax.random.uniform(kb, (1, fan_out), jnp.float32, -bound, bound)
        return w, b

    keys = jax.random.split(key, 6)
    w1a, b1a = linear(keys[0], obs_dim, hidden_size)
    w2a, b2a = linear(keys[1], hidden_size, hidden_size)
    w3a, b3a = linear(keys[2], hidden_size, act_dim)
    w1c, b1c = linear(keys[3], obs_dim, hidden_size)
    w2c, b2c = linear(keys[4], hidden_size, hidden_size)
    w3c, b3c = linear(keys[5], hidden_size, 1)
    return dict(
        w1a=w1a, b1a=b1a, w2a=w2a, b2a=b2a, w3a=w3a, b3a=b3a,
        w1c=w1c, b1c=b1c, w2c=w2c, b2c=b2c, w3c=w3c, b3c=b3c,
    )


def reference_forward_f32(x, p):
    """Pure-JAX f32 reference (mirrors the PyTorch module exactly)."""
    h = jnp.tanh(x @ p["w1a"] + p["b1a"])
    h = jnp.tanh(h @ p["w2a"] + p["b2a"])
    probs = jax.nn.softmax(h @ p["w3a"] + p["b3a"], axis=-1)
    hc = jnp.tanh(x @ p["w1c"] + p["b1c"])
    hc = jnp.tanh(hc @ p["w2c"] + p["b2c"])
    value = hc @ p["w3c"] + p["b3c"]
    return probs, value


def reference_forward_bf16(x, p):
    """Reference mirroring the kernel's arithmetic: bf16 MXU operands, f32 accumulate."""
    bf16 = jnp.bfloat16

    def mm(a, w):
        return jnp.dot(a.astype(bf16), w.astype(bf16), preferred_element_type=jnp.float32)

    h = jnp.tanh(mm(x, p["w1a"]) + p["b1a"])
    h = jnp.tanh(mm(h, p["w2a"]) + p["b2a"])
    probs = jax.nn.softmax(mm(h, p["w3a"]) + p["b3a"], axis=-1)
    hc = jnp.tanh(mm(x, p["w1c"]) + p["b1c"])
    hc = jnp.tanh(mm(hc, p["w2c"]) + p["b2c"])
    value = mm(hc, p["w3c"]) + p["b3c"]
    return probs, value


# TODO(synk): get_action_and_value's Categorical sampling / log_prob is host-side RL plumbing
# and intentionally not part of this forward-pass kernel.

if __name__ == "__main__":
    obs_dim, act_dim, hidden_size, batch = 16, 4, 32, 2

    key = jax.random.PRNGKey(0)
    k_params, k_x = jax.random.split(key)
    params = init_params(k_params, obs_dim, act_dim, hidden_size)
    x = jax.random.normal(k_x, (batch, obs_dim), jnp.float32)

    packed = pack_params(params, obs_dim, act_dim, hidden_size)
    probs, value = actor_critic_forward(
        x, packed, obs_dim=obs_dim, act_dim=act_dim, hidden=hidden_size
    )
    jax.block_until_ready((probs, value))

    assert probs.shape == (batch, act_dim) and value.shape == (batch, 1)

    # Tight check against a reference using the same bf16-operand / f32-accumulate math.
    probs_bf, value_bf = reference_forward_bf16(x, params)
    assert jnp.allclose(probs, probs_bf, atol=2e-3, rtol=2e-3), float(
        jnp.max(jnp.abs(probs - probs_bf))
    )
    assert jnp.allclose(value, value_bf, atol=2e-3, rtol=2e-3), float(
        jnp.max(jnp.abs(value - value_bf))
    )

    # Loose check against the pure-f32 reference (bf16 operand rounding ~0.4% per layer).
    probs_f32, value_f32 = reference_forward_f32(x, params)
    assert jnp.allclose(probs, probs_f32, atol=5e-2), float(
        jnp.max(jnp.abs(probs - probs_f32))
    )
    assert jnp.allclose(value, value_f32, atol=5e-2), float(
        jnp.max(jnp.abs(value - value_f32))
    )
    assert jnp.allclose(jnp.sum(probs, axis=-1), 1.0, atol=1e-4)

    print("KERNEL_OK")
</pallas_src>

<mosaic_0001>
module attributes {stable_mosaic.version = 11 : i64} {
  func.func @fused_actor_critic_kernel(%arg0: i32, %arg1: memref<8x16xf32, #tpu.memory_space<vmem>>, %arg2: memref<296x128xf32, #tpu.memory_space<vmem>>, %arg3: memref<8x128xf32, #tpu.memory_space<vmem>>) attributes {dimension_semantics = [#tpu.dimension_semantics<parallel>], iteration_bounds = array<i64: 1>, scalar_prefetch = 0 : i64, scratch_operands = 0 : i64, tpu.core_type = #tpu.core_type<tc>, window_params = [{transform_indices = @transform_0, window_bounds = array<i64: 8, 16>}, {pipeline_mode = #tpu.pipeline_mode<synchronous>, transform_indices = @transform_1, window_bounds = array<i64: 296, 128>}, {transform_indices = @transform_2, window_bounds = array<i64: 8, 128>}]} {
    %c0 = arith.constant 0 : index
    %c0_0 = arith.constant 0 : index
    %0 = vector.load %arg1[%c0, %c0_0] : memref<8x16xf32, #tpu.memory_space<vmem>>, vector<8x16xf32>
    %1 = arith.truncf %0 : vector<8x16xf32> to vector<8x16xbf16>
    %c0_1 = arith.constant 0 : index
    %c0_2 = arith.constant 0 : index
    %2 = vector.load %arg2[%c0_1, %c0_2] : memref<296x128xf32, #tpu.memory_space<vmem>>, vector<16x128xf32>
    %3 = arith.truncf %2 : vector<16x128xf32> to vector<16x128xbf16>
    %c16 = arith.constant 16 : index
    %c0_3 = arith.constant 0 : index
    %4 = vector.load %arg2[%c16, %c0_3] : memref<296x128xf32, #tpu.memory_space<vmem>>, vector<128x128xf32>
    %5 = arith.truncf %4 : vector<128x128xf32> to vector<128x128xbf16>
    %c144 = arith.constant 144 : index
    %c0_4 = arith.constant 0 : index
    %6 = vector.load %arg2[%c144, %c0_4] : memref<296x128xf32, #tpu.memory_space<vmem>>, vector<128x128xf32>
    %7 = arith.truncf %6 : vector<128x128xf32> to vector<128x128xbf16>
    %c272 = arith.constant 272 : index
    %c0_5 = arith.constant 0 : index
    %8 = vector.load %arg2[%c272, %c0_5] : memref<296x128xf32, #tpu.memory_space<vmem>>, vector<1x128xf32>
    %c280 = arith.constant 280 : index
    %c0_6 = arith.constant 0 : index
    %9 = vector.load %arg2[%c280, %c0_6] : memref<296x128xf32, #tpu.memory_space<vmem>>, vector<1x128xf32>
    %c288 = arith.constant 288 : index
    %c0_7 = arith.constant 0 : index
    %10 = vector.load %arg2[%c288, %c0_7] : memref<296x128xf32, #tpu.memory_space<vmem>>, vector<1x128xf32>
    %cst = arith.constant dense<0.000000e+00> : vector<8x128xf32>
    %11 = tpu.matmul %1, %3, %cst {dimension_numbers = #tpu.dot_dimension_numbers<[1], [0], [0], [1], [0, 0, 1, 1], [], []>} : vector<8x16xbf16>, vector<16x128xbf16>, vector<8x128xf32> -> vector<8x128xf32>
    %12 = vector.broadcast %8 : vector<1x128xf32> to vector<8x128xf32>
    %13 = arith.addf %11, %12 : vector<8x128xf32>
    %14 = math.tanh %13 : vector<8x128xf32>
    %15 = arith.truncf %14 : vector<8x128xf32> to vector<8x128xbf16>
    %cst_8 = arith.constant dense<0.000000e+00> : vector<8x128xf32>
    %16 = tpu.matmul %15, %5, %cst_8 {dimension_numbers = #tpu.dot_dimension_numbers<[1], [0], [0], [1], [0, 0, 1, 1], [], []>} : vector<8x128xbf16>, vector<128x128xbf16>, vector<8x128xf32> -> vector<8x128xf32>
    %17 = vector.broadcast %9 : vector<1x128xf32> to vector<8x128xf32>
    %18 = arith.addf %16, %17 : vector<8x128xf32>
    %19 = math.tanh %18 : vector<8x128xf32>
    %20 = arith.truncf %19 : vector<8x128xf32> to vector<8x128xbf16>
    %cst_9 = arith.constant dense<0.000000e+00> : vector<8x128xf32>
    %21 = tpu.matmul %20, %7, %cst_9 {dimension_numbers = #tpu.dot_dimension_numbers<[1], [0], [0], [1], [0, 0, 1, 1], [], []>} : vector<8x128xbf16>, vector<128x128xbf16>, vector<8x128xf32> -> vector<8x128xf32>
    %22 = vector.broadcast %10 : vector<1x128xf32> to vector<8x128xf32>
    %23 = arith.addf %21, %22 : vector<8x128xf32>
    %24 = tpu.iota {dimensions = array<i32: 1>} : vector<8x128xi32>
    %c4_i32 = arith.constant 4 : i32
    %25 = vector.broadcast %c4_i32 : i32 to vector<8x128xi32>
    %26 = arith.cmpi slt, %24, %25 : vector<8x128xi32>
    %c4_i32_10 = arith.constant 4 : i32
    %27 = vector.broadcast %c4_i32_10 : i32 to vector<8x128xi32>
    %28 = arith.cmpi eq, %24, %27 : vector<8x128xi32>
    %cst_11 = arith.constant 0xFF800000 : f32
    %29 = vector.broadcast %cst_11 : f32 to vector<8x128xf32>
    %30 = arith.select %26, %23, %29 : vector<8x128xi1>, vector<8x128xf32>
    %cst_12 = arith.constant dense<0xFF800000> : vector<8xf32>
    %31 = vector.multi_reduction <maximumf>, %30, %cst_12 [1] : vector<8x128xf32> to vector<8xf32>
    %32 = vector.shape_cast %31 : vector<8xf32> to vector<8x1xf32>
    %33 = vector.broadcast %32 : vector<8x1xf32> to vector<8x128xf32>
    %34 = arith.subf %23, %33 : vector<8x128xf32>
    %35 = math.exp %34 : vector<8x128xf32>
    %cst_13 = arith.constant 0.000000e+00 : f32
    %36 = vector.broadcast %cst_13 : f32 to vector<8x128xf32>
    %37 = arith.select %26, %35, %36 : vector<8x128xi1>, vector<8x128xf32>
    %cst_14 = arith.constant dense<0.000000e+00> : vector<8xf32>
    %38 = vector.multi_reduction <add>, %37, %cst_14 [1] : vector<8x128xf32> to vector<8xf32>
    %39 = vector.shape_cast %38 : vector<8xf32> to vector<8x1xf32>
    %40 = tpu.reciprocal %39 {approx = true} : vector<8x1xf32> -> vector<8x1xf32>
    %41 = arith.mulf %39, %40 : vector<8x1xf32>
    %cst_15 = arith.constant 2.000000e+00 : f32
    %42 = vector.broadcast %cst_15 : f32 to vector<8x1xf32>
    %43 = arith.subf %42, %41 : vector<8x1xf32>
    %44 = arith.mulf %40, %43 : vector<8x1xf32>
    %45 = vector.broadcast %44 : vector<8x1xf32> to vector<8x128xf32>
    %46 = arith.mulf %37, %45 : vector<8x128xf32>
    %cst_16 = arith.constant 0.000000e+00 : f32
    %47 = vector.broadcast %cst_16 : f32 to vector<8x128xf32>
    %48 = arith.select %28, %23, %47 : vector<8x128xi1>, vector<8x128xf32>
    %49 = arith.select %26, %46, %48 : vector<8x128xi1>, vector<8x128xf32>
    %c0_17 = arith.constant 0 : index
    %c0_18 = arith.constant 0 : index
    %50 = vector.load %arg3[%c0_17, %c0_18] : memref<8x128xf32, #tpu.memory_space<vmem>>, vector<8x128xf32>
    tpu.vector_store %arg3[%c0_17, %c0_18], %49 {strides = array<i32>} : memref<8x128xf32, #tpu.memory_space<vmem>>, vector<8x128xf32>,
    return
  }
  func.func @transform_0(%arg0: i32) -> (i32, i32) {
    %c0_i32 = arith.constant 0 : i32
    %c0_i32_0 = arith.constant 0 : i32
    return %arg0, %c0_i32 : i32, i32
  }
  func.func @transform_1(%arg0: i32) -> (i32, i32) {
    %c0_i32 = arith.constant 0 : i32
    %c0_i32_0 = arith.constant 0 : i32
    %c0_i32_1 = arith.constant 0 : i32
    return %c0_i32, %c0_i32_0 : i32, i32
  }
  func.func @transform_2(%arg0: i32) -> (i32, i32) {
    %c0_i32 = arith.constant 0 : i32
    %c0_i32_0 = arith.constant 0 : i32
    return %arg0, %c0_i32 : i32, i32
  }
}

</mosaic_0001>

<bundles_post_ra>
// kernel: tpu_custom_call.1
= control target key start
LH: loop header
LB: loop body
LE: loop exit
PB: predicated region body
PF: predicated region fallthrough
CT: control target
= control target key end

     0   :  { %7 = vsyncpa [#allocation3], 0  ;;  %s520_s0 = inlined_call_operand.hbm [shape: f32[8,16], index: 0, kind: input, shape index: {}]   ;;  %s521_s1 = inlined_call_operand.hbm [shape: f32[296,128], index: 1, kind: input, shape index: {}]   ;;  %s522_s2 = inlined_call_operand.hbm [shape: f32[8,128], index: 2, kind: output, shape index: {}]  }
   0x1   :  { %8 = vsyncpa [#allocation6], 0 }
   0x2   :  { %9 = vsyncpa [#allocation4], 0  ;;  %s429_s9 = smov [#allocation2]   ;;  %s430_s11 = smov [#allocation5]  }
   0x3   :  { %s16_s10 = sshll.u32 %s429_s9, 4  ;;  %s25_s12 = sshll.u32 %s430_s11, 4  ;;  %s17_s10 = int_to_ptr.vmem [resolvable:$true] %s16_s10  ;;  %s451_s12 = int_to_ptr.vmem [resolvable:$true] %s25_s12 }
   0x4   :  { %s357_s15 = scalar_lea.hbm %s520_s0, 128 }
   0x5   :  { %p358_p0 = scmp.ne.s32.totalorder %s520_s0, %s357_s15  ;;  %p361_p1 = scmp.lt.u32.totalorder %s357_s15, %s520_s0 }
   0x7   :  { %p363_p2 = pnand %p361_p1, %p358_p0 }
   0x9   :  { %366 = shalt.err (!%p363_p2)
}
   0xa   :  { %s367_s20 = scalar_lea.vmem %s17_s10, 128  ;;  %p372_p4 = scmp.lt.s32.totalorder %s17_s10, %s17_s10 }
   0xb   :  { %p368_p3 = scmp.ne.s32.totalorder %s17_s10, %s367_s20  ;;  %p373_p5 = scmp.lt.s32.totalorder %s367_s20, %s367_s20 }
   0xd   :  { %p374_p6 = por %p373_p5, %p372_p4 }
   0xf   :  { %p375_p7 = pnand %p374_p6, %p368_p3 }
  0x11   :  { %378 = shalt.err (!%p375_p7)
}
  0x12   :  { %19 = dma.hbm_to_vmem [thread:$0]  %s520_s0, 128, %s17_s10, [#allocation3]  }
  0x13   :  { %s379_s25 = scalar_lea.hbm %s521_s1, 4736 }
  0x14   :  { %p380_p8 = scmp.ne.s32.totalorder %s521_s1, %s379_s25  ;;  %p383_p9 = scmp.lt.u32.totalorder %s379_s25, %s521_s1 }
  0x16   :  { %p385_p10 = pnand %p383_p9, %p380_p8 }
  0x18   :  { %388 = shalt.err (!%p385_p10)
}
  0x19   :  { %s389_s30 = scalar_lea.vmem %s451_s12, 4736  ;;  %p394_p12 = scmp.lt.s32.totalorder %s451_s12, %s451_s12 }
  0x1a   :  { %p390_p11 = scmp.ne.s32.totalorder %s451_s12, %s389_s30  ;;  %p395_p13 = scmp.lt.s32.totalorder %s389_s30, %s389_s30 }
  0x1c   :  { %p396_p0 = por %p395_p13, %p394_p12 }
  0x1e   :  { %p397_p1 = pnand %p396_p0, %p390_p11 }
  0x20   :  { %400 = shalt.err (!%p397_p1)
}
  0x21   :  { %s431_s0 = smov 128   ;;  %s432_s3 = smov 8  }
  0x22   :  { %31 = dma.hbm_to_vmem [thread:$0]  %s521_s1, 4736, %s451_s12, [#allocation6], %s431_s0, %s431_s0, %s432_s3  }
  0x23   :  { %423 = dma.done.wait [#allocation3], 128  }
  0x24   :  { %424 = vsyncadd [#allocation3], 4294967168 }
  0x25   :  { %425 = dma.done.wait [#allocation6], 4736  }
  0x26   :  { %426 = vsyncadd [#allocation6], 4294962560  ;;  %v433_v0 = vmov 0.0   ;;  %vm434_vm0 = vmmov 0   ;;  %v41_v1 = vld [vmem:[#allocation5] sm:$0xff]  ;;  %v42_v2 = vld [vmem:[#allocation5 + $0x8] sm:$0xff] }
  0x27   :  { %296 = vmatprep.subr.bf16.mxu0 %v433_v0  ;;  %298 = vmatprep.mubr.msk.bf16.mxu0 %vm434_vm0, %v433_v0  ;;  %v39_v3 = vld [vmem:[#allocation2] sm:$0xff]  ;;  %v43_v4 = vpack.c.bf16 %v42_v2, %v41_v1  ;;  %v44_v5 = vld [vmem:[#allocation5 + $0x10] sm:$0xff]  ;;  %v46_v7 = vld [vmem:[#allocation5 + $0x20] sm:$0xff]  ;;  %vm99_vm1 = vcmask 130048   ;;  %s435_s1 = smov [#allocation7]  }
  0x28   :  { %302 = vmatprep.subr.bf16.mxu1 %v433_v0  ;;  %318 = vmatprep.mubr.msk.bf16.mxu1 %vm434_vm0, %v433_v0  ;;  %v45_v6 = vld [vmem:[#allocation5 + $0x18] sm:$0xff]  ;;  %v40_v8 = vpack.c.bf16 %v39_v3, %v39_v3  ;;  %v47_v10 = vld [vmem:[#allocation5 + $0x28] sm:$0xff]  ;;  %v48_v12 = vld [vmem:[#allocation5 + $0x30] sm:$0xff]  ;;  %s262_s6 = sshll.u32 %s435_s1, 4  ;;  %s263_s6 = int_to_ptr.vmem [resolvable:$true] %s262_s6 }
  0x29   :  { %v60_v9 = vpack.c.bf16 %v45_v6, %v44_v5  ;;  %297 = vmatpush3.bf16.msra.mxu0 %v43_v4  ;;  %v61_v11 = vpack.c.bf16 %v47_v10, %v46_v7  ;;  %v49_v13 = vld [vmem:[#allocation5 + $0x38] sm:$0xff]  ;;  %v50_v15 = vld [vmem:[#allocation5 + $0x40] sm:$0xff]  ;;  %v51_v16 = vld [vmem:[#allocation5 + $0x48] sm:$0xff]  ;;  %v235_v7 = vlaneseq  ;;  %s401_s7 = scalar_lea.vmem %s263_s6, 128  ;;  %p406_p3 = scmp.lt.s32.totalorder %s263_s6, %s263_s6 }
  0x2a   :  { %322 = vmatprep.subr.bf16.mxu0 %v433_v0  ;;  %v62_v14 = vpack.c.bf16 %v49_v13, %v48_v12  ;;  %v63_v17 = vpack.c.bf16 %v51_v16, %v50_v15  ;;  %v52_v18 = vld [vmem:[#allocation5 + $0x50] sm:$0xff]  ;;  %v53_v19 = vld [vmem:[#allocation5 + $0x58] sm:$0xff]  ;;  %v54_v21 = vld [vmem:[#allocation5 + $0x60] sm:$0xff]  ;;  %p402_p2 = scmp.ne.s32.totalorder %s263_s6, %s401_s7  ;;  %p407_p4 = scmp.lt.s32.totalorder %s401_s7, %s401_s7 }
  0x2b   :  { %303 = vmatpush3.bf16.msra.mxu1 %v60_v9  ;;  %v64_v20 = vpack.c.bf16 %v53_v19, %v52_v18  ;;  %v55_v22 = vld [vmem:[#allocation5 + $0x68] sm:$0xff]  ;;  %v56_v24 = vld [vmem:[#allocation5 + $0x70] sm:$0xff]  ;;  %v57_v25 = vld [vmem:[#allocation5 + $0x78] sm:$0xff] }
  0x2c   :  { %304 = vmatprep.subr.bf16.mxu1 %v433_v0  ;;  %299 = vmatmul.mubr.msk.bf16.vlgmr.msra.gmra.mrb[0].mxu0 %vm99_vm1, %v40_v8  ;;  %v65_v23 = vpack.c.bf16 %v55_v22, %v54_v21  ;;  %v66_v26 = vpack.c.bf16 %v57_v25, %v56_v24  ;;  %v58_v27 = vld [vmem:[#allocation5 + $0x80] sm:$0xff]  ;;  %v59_v28 = vld [vmem:[#allocation5 + $0x88] sm:$0xff]  ;;  %v68_v30 = vld [vmem:[#allocation5 + $0x90] sm:$0xff]  ;;  %v236_v8 = vand.u32 127, %v235_v7  ;;  %p408_p5 = por %p407_p4, %p406_p3 }
  0x2d   :  { %338 = vmatprep.mubr.msk.bf16.mxu0 %vm434_vm0, %v433_v0  ;;  %v67_v29 = vpack.c.bf16 %v59_v28, %v58_v27  ;;  %v69_v31 = vld [vmem:[#allocation5 + $0x98] sm:$0xff]  ;;  %v70_v32 = vld [vmem:[#allocation5 + $0xa0] sm:$0xff]  ;;  %v71_v34 = vld [vmem:[#allocation5 + $0xa8] sm:$0xff] }
  0x2e   :  { %v84_v33 = vpack.c.bf16 %v69_v31, %v68_v30  ;;  %v85_v35 = vpack.c.bf16 %v71_v34, %v70_v32  ;;  %v72_v36 = vld [vmem:[#allocation5 + $0xb0] sm:$0xff]  ;;  %v73_v37 = vld [vmem:[#allocation5 + $0xb8] sm:$0xff]  ;;  %v74_v39 = vld [vmem:[#allocation5 + $0xc0] sm:$0xff]  ;;  %vm237_vm2 = vcmp.lt.s32.totalorder %v236_v8, 4  ;;  %vm238_vm3 = vcmp.eq.s32.totalorder %v236_v8, 4  ;;  %p409_p6 = pnand %p408_p5, %p402_p2 }
  0x2f   :  { %305 = vmatpush3.bf16.msra.mxu1 %v61_v11  ;;  %v86_v38 = vpack.c.bf16 %v73_v37, %v72_v36  ;;  %v75_v40 = vld [vmem:[#allocation5 + $0xc8] sm:$0xff]  ;;  %v272_v42 = vld [vmem:[#allocation5 + $0x110] ss:$0 sm:$0xff]  ;;  %v77_v51 = vld [vmem:[#allocation5 + $0xd8] sm:$0xff] }
  0x30   :  { %306 = vmatprep.subr.bf16.mxu1 %v433_v0  ;;  %323 = vmatpush3.bf16.msra.mxu0 %v84_v33  ;;  %v87_v41 = vpack.c.bf16 %v75_v40, %v74_v39  ;;  %v76_v50 = vld [vmem:[#allocation5 + $0xd0] sm:$0xff]  ;;  %v78_v53 = vld [vmem:[#allocation5 + $0xe0] sm:$0xff]  ;;  %v79_v54 = vld [vmem:[#allocation5 + $0xe8] sm:$0xff] }
  0x31   :  { %324 = vmatprep.subr.bf16.mxu0 %v433_v0  ;;  %v88_v52 = vpack.c.bf16 %v77_v51, %v76_v50  ;;  %v89_v55 = vpack.c.bf16 %v79_v54, %v78_v53  ;;  %v80_v56 = vld [vmem:[#allocation5 + $0xf0] sm:$0xff]  ;;  %v81_v57 = vld [vmem:[#allocation5 + $0xf8] sm:$0xff]  ;;  %v82_v59 = vld [vmem:[#allocation5 + $0x100] sm:$0xff] }
  0x32   :  { %v90_v58 = vpack.c.bf16 %v81_v57, %v80_v56  ;;  %v83_v60 = vld [vmem:[#allocation5 + $0x108] sm:$0xff]  ;;  %v274_v62 = vld [vmem:[#allocation5 + $0x118] ss:$0 sm:$0xff]  ;;  %v275_v9 = vld [vmem:[#allocation5 + $0x120] ss:$0 sm:$0xff] }
  0x33   :  { %307 = vmatpush3.bf16.msra.mxu1 %v62_v14  ;;  %v91_v61 = vpack.c.bf16 %v83_v60, %v82_v59 }
  0x34   :  { %308 = vmatprep.subr.bf16.mxu1 %v433_v0  ;;  %325 = vmatpush3.bf16.msra.mxu0 %v85_v35 }
  0x35   :  { %326 = vmatprep.subr.bf16.mxu0 %v433_v0 }
  0x37   :  { %309 = vmatpush3.bf16.msra.mxu1 %v63_v17 }
  0x38   :  { %310 = vmatprep.subr.bf16.mxu1 %v433_v0  ;;  %327 = vmatpush3.bf16.msra.mxu0 %v86_v38 }
  0x39   :  { %328 = vmatprep.subr.bf16.mxu0 %v433_v0 }
  0x3b   :  { %311 = vmatpush3.bf16.msra.mxu1 %v64_v20 }
  0x3c   :  { %312 = vmatprep.subr.bf16.mxu1 %v433_v0  ;;  %329 = vmatpush3.bf16.msra.mxu0 %v87_v41 }
  0x3d   :  { %330 = vmatprep.subr.bf16.mxu0 %v433_v0 }
  0x3f   :  { %313 = vmatpush3.bf16.msra.mxu1 %v65_v23 }
  0x40   :  { %314 = vmatprep.subr.bf16.mxu1 %v433_v0  ;;  %331 = vmatpush3.bf16.msra.mxu0 %v88_v52 }
  0x41   :  { %332 = vmatprep.subr.bf16.mxu0 %v433_v0 }
  0x43   :  { %315 = vmatpush3.bf16.msra.mxu1 %v66_v26 }
  0x44   :  { %316 = vmatprep.subr.bf16.mxu1 %v433_v0  ;;  %333 = vmatpush3.bf16.msra.mxu0 %v89_v55 }
  0x45   :  { %334 = vmatprep.subr.bf16.mxu0 %v433_v0 }
  0x47   :  { %317 = vmatpush3.bf16.msra.mxu1 %v67_v29 }
  0x48   :  { %335 = vmatpush3.bf16.msra.mxu0 %v90_v58 }
  0x49   :  { %336 = vmatprep.subr.bf16.mxu0 %v433_v0 }
  0x4c   :  { %337 = vmatpush3.bf16.msra.mxu0 %v91_v61 }
  0xff   :  { %v137_v43 = vpop.f32.mrb[0].mxu0 }
 0x100   :  { %v138_v44 = vadd.f32 %v272_v42, %v137_v43  ;;  %v300_v45 = vpop.f32.mrb[1].mxu0 }
 0x101   :  { %v140_v46 = vpop.f32.mrb[2].mxu0 }
 0x102   :  { %349 = vtanh.f32 %v138_v44  ;;  %v301_v47 = vpop.f32.mrb[3].mxu0 }
 0x10c   :  { %v350_v48 = vpop.eup %349 }
 0x10d   :  { %v144_v49 = vpack.c.bf16 %v350_v48, %v350_v48 }
 0x10f   :  { %319 = vmatmul.mubr.bf16.vlgmr.msra.gmra.mrb[0].mxu1 %v144_v49 }
 0x1e2   :  { %v183_v63 = vpop.f32.mrb[0].mxu1 }
 0x1e3   :  { %v184_v1 = vadd.f32 %v274_v62, %v183_v63  ;;  %v320_v2 = vpop.f32.mrb[1].mxu1 }
 0x1e4   :  { %v186_v3 = vpop.f32.mrb[2].mxu1 }
 0x1e5   :  { %351 = vtanh.f32 %v184_v1  ;;  %v321_v4 = vpop.f32.mrb[3].mxu1 }
 0x1ef   :  { %v352_v5 = vpop.eup %351 }
 0x1f0   :  { %v190_v6 = vpack.c.bf16 %v352_v5, %v352_v5 }
 0x1f2   :  { %339 = vmatmul.mubr.bf16.vlgmr.msra.gmra.mrb[4].mxu0 %v190_v6 }
 0x2c5   :  { %v229_v10 = vpop.f32.mrb[4].mxu0 }
 0x2c6   :  { %v230_v0 = vadd.f32 %v275_v9, %v229_v10  ;;  %v340_v11 = vpop.f32.mrb[5].mxu0 }
 0x2c7   :  { %v232_v12 = vpop.f32.mrb[6].mxu0 }
 0x2c8   :  { %v341_v13 = vpop.f32.mrb[7].mxu0  ;;  %v239_v14 = vsel %vm237_vm2, %v230_v0, -inf  ;;  %v253_v26 = vsel %vm238_vm3, %v230_v0, 0.0 }
 0x2c9   :  { %240 = vmax.xlane.f32.xlu0 %v239_v14 }
 0x356   :  { %v241_v15 = vpop.xlane.xlu0 %240 }
 0x357   :  { %v242_v16 = vsub.f32 %v230_v0, %v241_v15 }
 0x359   :  { %v243_v17 = vmul.f32 1.442695, %v242_v16 }
 0x35b   :  { %353 = vpow2.f32 %v243_v17 }
 0x365   :  { %v354_v18 = vpop.eup %353 }
 0x366   :  { %v245_v19 = vsel %vm237_vm2, %v354_v18, 0.0 }
 0x367   :  { %246 = vadd.xlane.f32.xlu0 %v245_v19 }
 0x3f4   :  { %v247_v20 = vpop.xlane.xlu0 %246 }
 0x3f5   :  { %355 = vrcp.f32 %v247_v20 }
 0x3ff   :  { %v356_v21 = vpop.eup %355 }
 0x400   :  { %v249_v22 = vmul.f32 %v356_v21, %v247_v20 }
 0x402   :  { %v250_v23 = vsub.f32 2.0, %v249_v22 }
 0x404   :  { %v251_v24 = vmul.f32 %v356_v21, %v250_v23 }
 0x406   :  { %v252_v25 = vmul.f32 %v251_v24, %v245_v19 }
 0x408   :  { %v254_v27 = vsel %vm237_vm2, %v252_v25, %v253_v26 }
 0x409   :  { %255 = vst [vmem:[#allocation7] sm:$0xff] %v254_v27 }
 0x40a   :  { %412 = shalt.err (!%p409_p6)
}
 0x40b   :  { %s413_s10 = scalar_lea.hbm %s522_s2, 128 }
 0x40c   :  { %p414_p7 = scmp.ne.s32.totalorder %s522_s2, %s413_s10  ;;  %p417_p8 = scmp.lt.u32.totalorder %s413_s10, %s522_s2 }
 0x40e   :  { %p419_p9 = pnand %p417_p8, %p414_p7 }
 0x410   :  { %422 = shalt.err (!%p419_p9)
}
 0x411   :  { %265 = dma.vmem_to_hbm [thread:$0]  %s263_s6, 128, %s522_s2, [#allocation4]  }
 0x412   :  { %427 = dma.done.wait [#allocation4], 128  }
 0x413   :  { %428 = vsyncadd [#allocation4], 4294967168 }
 0x414   :  { %269 = vsyncpa [#allocation3], 1 }
 0x415   :  { %270 = vsyncpa [#allocation6], 1 }
 0x416   :  { %271 = vsyncpa [#allocation4], 1 }

</bundles_post_ra>
